<compile_context>
chip_gen: v6e
topology: v6e:2x2x1
jax: 0.10.0
libtpu: 0.0.40
codegen_flags: <defaults>
</compile_context>

<pallas_src>
import jax
import jax.numpy as jnp
from jax.experimental import pallas as pl
from jax.experimental.pallas import tpu as pltpu

NEG_SLOPE = 0.01  # nn.LeakyReLU default


def _leaky(x):
    return jnp.where(x >= 0, x, NEG_SLOPE * x)


def _make_rcu_kernel(H):
    """Kernel closure over the per-image height H (needed for halo masks)."""

    def kernel(x_ref, u1_ref, b1_ref, u2_ref, b2_ref, o_ref):
        # x_ref/o_ref: (M, WC) with M = batch_group*H (images stacked on rows)
        # u*_ref:      (3*WC, WC) stacked banded conv weights
        # b*_ref:      (1, WC)    bias tiled over W (conv2's scaled by gamma)
        M, WC = x_ref.shape

        x = x_ref[...].astype(jnp.float32)

        # Per-image first/last-row masks (replace zero halo rows).  Computed
        # once, reused by both convs.
        rows = jax.lax.broadcasted_iota(jnp.int32, (M, WC), 0)
        rmod = rows % H
        first_row = rmod == 0          # padded row h-1 is zero here
        last_row = rmod == (H - 1)     # padded row h+1 is zero here

        def conv3x3(act, u_ref, b_ref):
            # H-shifts stay in registers: XLU rolls + VPU masks, no VMEM trip.
            down = jnp.where(first_row, 0.0, pltpu.roll(act, shift=1, axis=0))
            up = jnp.where(last_row, 0.0, pltpu.roll(act, shift=M - 1, axis=0))
            # im2col slab (M, 3*WC); pieces are full 128-lane blocks so the
            # concat is just vreg placement.
            slab = jnp.concatenate([down, act, up], axis=1)
            # Single MXU matmul per conv; banded weights encode the 3
            # W-direction taps and the W-edge zero padding.
            y = jnp.dot(slab, u_ref[...], preferred_element_type=jnp.float32)
            return y + b_ref[...]      # (1, WC) bias broadcast over rows

        y = conv3x3(_leaky(x), u1_ref, b1_ref)   # conv1(leaky_relu(x))
        y = conv3x3(_leaky(y), u2_ref, b2_ref)   # gamma*conv2(leaky_relu(.))
        o_ref[...] = (y + x).astype(o_ref.dtype)  # residual add

    return kernel


def _banded_weights(w_hwio, W):
    """(3, 3, Cin, Cout) HWIO -> (3*W*C, W*C) stacked banded matrices.

    U[dh*WC + (w+dw-1)*C + ci, w*C + co] = w_hwio[dh, dw, ci, co] (in range),
    so `[down | act | up] @ U` applies the full 3x3 conv including W padding.
    """
    C = w_hwio.shape[-1]
    mats = []
    for dh in range(3):
        m = jnp.zeros((W * C, W * C), jnp.float32)
        for dw in range(3):
            sel = jnp.eye(W, W, k=1 - dw, dtype=jnp.float32)   # (W, W)
            m = m + jnp.kron(sel, w_hwio[dh, dw].astype(jnp.float32))
        mats.append(m)
    return jnp.concatenate(mats, axis=0)   # (3*W*C, W*C)


def prepare_rcu_params(w1, b1, w2, b2, gamma, W):
    """Hoisted out of the per-call path: run once per weight update."""
    C = w1.shape[-1]
    WC = W * C
    gamma = gamma.reshape(C).astype(jnp.float32)
    # Fold layer-scale gamma into conv2 (broadcast over Cout).
    w2f = w2.astype(jnp.float32) * gamma.reshape(1, 1, 1, C)
    b2f = b2.reshape(C).astype(jnp.float32) * gamma

    u1 = _banded_weights(w1, W)                                  # (3*WC, WC)
    u2 = _banded_weights(w2f, W)                                 # (3*WC, WC)
    b1t = jnp.tile(b1.reshape(C).astype(jnp.float32), W).reshape(1, WC)
    b2t = jnp.tile(b2f, W).reshape(1, WC)
    return u1, b1t, u2, b2t


def residual_conv_unit(x_nhwc, params, *, batch_group=None):
    """x_nhwc: (N, H, W, C) float32.  params from prepare_rcu_params."""
    u1, b1t, u2, b2t = params
    N, H, W, C = x_nhwc.shape
    WC = W * C
    assert WC % 128 == 0, "lane-dense layout needs W*C to be a multiple of 128"

    if batch_group is None:
        # Keep >=2 'parallel' grid steps for v7x's two TensorCores while
        # growing M per matmul with N.  (On v5e/v6e pass batch_group=N to
        # fuse the whole batch into one fat dot.)
        batch_group = max(1, N // 2)
    assert N % batch_group == 0
    steps = N // batch_group
    M = batch_group * H
    assert M % 8 == 0, "row block must be sublane-aligned"

    x2d = x_nhwc.reshape(N * H, WC)    # lane-dense: trailing dim = W*C

    # Advisory cost estimate: 2 convs of (N*H, 3*WC) x (3*WC, WC) matmuls.
    flops = 2 * 2 * (N * H) * (3 * WC) * WC
    bytes_accessed = 2 * N * H * WC * 4 + 2 * (3 * WC * WC) * 4 + 2 * WC * 4

    const_w_spec = lambda: pl.BlockSpec(
        (3 * WC, WC), lambda i: (0, 0), pipeline_mode=pl.Buffered(1))
    const_b_spec = lambda: pl.BlockSpec(
        (1, WC), lambda i: (0, 0), pipeline_mode=pl.Buffered(1))

    out = pl.pallas_call(
        _make_rcu_kernel(H),
        out_shape=jax.ShapeDtypeStruct((N * H, WC), x_nhwc.dtype),
        grid_spec=pltpu.PrefetchScalarGridSpec(
            num_scalar_prefetch=0,
            grid=(steps,),
            in_specs=[
                pl.BlockSpec((M, WC), lambda i: (i, 0)),
                const_w_spec(),
                const_b_spec(),
                const_w_spec(),
                const_b_spec(),
            ],
            out_specs=pl.BlockSpec((M, WC), lambda i: (i, 0)),
        ),
        compiler_params=pltpu.CompilerParams(
            dimension_semantics=("parallel",)),
        cost_estimate=pl.CostEstimate(
            flops=flops, transcendentals=0, bytes_accessed=bytes_accessed),
    )(x2d, u1, b1t, u2, b2t)
    return out.reshape(N, H, W, C)


def _reference(x_nhwc, w1, b1, w2, b2, gamma):
    """Pure-JAX reference (NHWC / HWIO), mirrors the PyTorch forward."""
    def conv(x, w, b):
        y = jax.lax.conv_general_dilated(
            x, w, window_strides=(1, 1), padding=((1, 1), (1, 1)),
            dimension_numbers=("NHWC", "HWIO", "NHWC"))
        return y + b.reshape(1, 1, 1, -1)

    out = _leaky(x_nhwc)
    out = conv(out, w1, b1)
    out = _leaky(out)
    out = conv(out, w2, b2)
    return gamma.reshape(1, 1, 1, -1) * out + x_nhwc


if __name__ == "__main__":
    # Small shapes consistent with the module: N=2, C=8, H=W=16 (W*C = 128).
    N, C, H, W = 2, 8, 16, 16
    key = jax.random.PRNGKey(0)
    kx, kw1, kb1, kw2, kb2 = jax.random.split(key, 5)

    # Input in PyTorch NCHW convention, transposed to NHWC for the kernel.
    x_nchw = jax.random.normal(kx, (N, C, H, W), dtype=jnp.float32)
    x_nhwc = jnp.transpose(x_nchw, (0, 2, 3, 1))

    # Conv2d-style init; torch weight (Cout,Cin,3,3) stored here as HWIO.
    fan_in = C * 3 * 3
    scale = 1.0 / jnp.sqrt(jnp.float32(fan_in))
    w1 = jax.random.uniform(kw1, (3, 3, C, C), jnp.float32, -scale, scale)
    b1 = jax.random.uniform(kb1, (C,), jnp.float32, -scale, scale)
    w2 = jax.random.uniform(kw2, (3, 3, C, C), jnp.float32, -scale, scale)
    b2 = jax.random.uniform(kb2, (C,), jnp.float32, -scale, scale)
    gamma = jnp.ones((C,), jnp.float32)  # layer_scale = 1.0

    # Weight preprocessing done once (hoisted out of the per-call path).
    params = jax.tree_util.tree_map(
        jax.block_until_ready, prepare_rcu_params(w1, b1, w2, b2, gamma, W))

    out = residual_conv_unit(x_nhwc, params)
    out = jax.block_until_ready(out)

    ref = _reference(x_nhwc, w1, b1, w2, b2, gamma)
    assert out.shape == (N, H, W, C)
    assert jnp.allclose(out, ref, atol=1e-4, rtol=1e-4), (
        float(jnp.max(jnp.abs(out - ref))))

    print("KERNEL_OK")
</pallas_src>

<mosaic_0001>
module attributes {stable_mosaic.version = 11 : i64} {
  func.func @kernel(%arg0: i32, %arg1: memref<16x128xf32, #tpu.memory_space<vmem>>, %arg2: memref<384x128xf32, #tpu.memory_space<vmem>>, %arg3: memref<1x128xf32, #tpu.memory_space<vmem>>, %arg4: memref<384x128xf32, #tpu.memory_space<vmem>>, %arg5: memref<1x128xf32, #tpu.memory_space<vmem>>, %arg6: memref<16x128xf32, #tpu.memory_space<vmem>>) attributes {dimension_semantics = [#tpu.dimension_semantics<parallel>], iteration_bounds = array<i64: 2>, scalar_prefetch = 0 : i64, scratch_operands = 0 : i64, tpu.core_type = #tpu.core_type<tc>, window_params = [{transform_indices = @transform_0, window_bounds = array<i64: 16, 128>}, {pipeline_mode = #tpu.pipeline_mode<synchronous>, transform_indices = @transform_1, window_bounds = array<i64: 384, 128>}, {pipeline_mode = #tpu.pipeline_mode<synchronous>, transform_indices = @transform_2, window_bounds = array<i64: 1, 128>}, {pipeline_mode = #tpu.pipeline_mode<synchronous>, transform_indices = @transform_3, window_bounds = array<i64: 384, 128>}, {pipeline_mode = #tpu.pipeline_mode<synchronous>, transform_indices = @transform_4, window_bounds = array<i64: 1, 128>}, {transform_indices = @transform_5, window_bounds = array<i64: 16, 128>}]} {
    %c0 = arith.constant 0 : index
    %c0_0 = arith.constant 0 : index
    %0 = vector.load %arg1[%c0, %c0_0] : memref<16x128xf32, #tpu.memory_space<vmem>>, vector<16x128xf32>
    %1 = tpu.iota {dimensions = array<i32: 0>} : vector<16x128xi32>
    %c16_i32 = arith.constant 16 : i32
    %c0_i32 = arith.constant 0 : i32
    %2 = arith.cmpi eq, %c16_i32, %c0_i32 : i32
    %c1_i32 = arith.constant 1 : i32
    %3 = arith.select %2, %c1_i32, %c16_i32 : i32
    %4 = vector.broadcast %3 : i32 to vector<16x128xi32>
    %5 = arith.remsi %1, %4 : vector<16x128xi32>
    %c0_i32_1 = arith.constant 0 : i32
    %6 = vector.broadcast %c0_i32_1 : i32 to vector<16x128xi32>
    %7 = arith.cmpi ne, %5, %6 : vector<16x128xi32>
    %c0_i32_2 = arith.constant 0 : i32
    %8 = vector.broadcast %c0_i32_2 : i32 to vector<16x128xi32>
    %9 = arith.cmpi slt, %5, %8 : vector<16x128xi32>
    %c0_i32_3 = arith.constant 0 : i32
    %10 = arith.cmpi slt, %3, %c0_i32_3 : i32
    %11 = vector.broadcast %10 : i1 to vector<16x128xi1>
    %12 = vector.broadcast %11 : vector<16x128xi1> to vector<16x128xi1>
    %13 = arith.xori %9, %12 : vector<16x128xi1>
    %14 = arith.andi %13, %7 : vector<16x128xi1>
    %15 = vector.broadcast %3 : i32 to vector<16x128xi32>
    %16 = arith.addi %5, %15 : vector<16x128xi32>
    %17 = arith.select %14, %16, %5 : vector<16x128xi1>, vector<16x128xi32>
    %c0_i32_4 = arith.constant 0 : i32
    %18 = vector.broadcast %c0_i32_4 : i32 to vector<16x128xi32>
    %19 = arith.cmpi eq, %17, %18 : vector<16x128xi32>
    %c15_i32 = arith.constant 15 : i32
    %20 = vector.broadcast %c15_i32 : i32 to vector<16x128xi32>
    %21 = arith.cmpi eq, %17, %20 : vector<16x128xi32>
    %cst = arith.constant 0.000000e+00 : f32
    %22 = vector.broadcast %cst : f32 to vector<16x128xf32>
    %23 = arith.cmpf oge, %0, %22 : vector<16x128xf32>
    %cst_5 = arith.constant 0.00999999977 : f32
    %24 = vector.broadcast %cst_5 : f32 to vector<16x128xf32>
    %25 = arith.mulf %24, %0 : vector<16x128xf32>
    %26 = arith.select %23, %0, %25 : vector<16x128xi1>, vector<16x128xf32>
    %c1_i32_6 = arith.constant 1 : i32
    %27 = tpu.dynamic_rotate %26 by %c1_i32_6 dim 0 : vector<16x128xf32>, i32 -> vector<16x128xf32>
    %cst_7 = arith.constant 0.000000e+00 : f32
    %28 = vector.broadcast %cst_7 : f32 to vector<16x128xf32>
    %29 = arith.select %19, %28, %27 : vector<16x128xi1>, vector<16x128xf32>
    %c15_i32_8 = arith.constant 15 : i32
    %30 = tpu.dynamic_rotate %26 by %c15_i32_8 dim 0 : vector<16x128xf32>, i32 -> vector<16x128xf32>
    %cst_9 = arith.constant 0.000000e+00 : f32
    %31 = vector.broadcast %cst_9 : f32 to vector<16x128xf32>
    %32 = arith.select %21, %31, %30 : vector<16x128xi1>, vector<16x128xf32>
    %33 = tpu.concatenate %29, %26, %32 in 1 : vector<16x128xf32>, vector<16x128xf32>, vector<16x128xf32> -> vector<16x384xf32>
    %c0_10 = arith.constant 0 : index
    %c0_11 = arith.constant 0 : index
    %34 = vector.load %arg2[%c0_10, %c0_11] : memref<384x128xf32, #tpu.memory_space<vmem>>, vector<384x128xf32>
    %cst_12 = arith.constant dense<0.000000e+00> : vector<16x128xf32>
    %35 = tpu.matmul %33, %34, %cst_12 {dimension_numbers = #tpu.dot_dimension_numbers<[1], [0], [0], [1], [0, 0, 1, 1], [], []>} : vector<16x384xf32>, vector<384x128xf32>, vector<16x128xf32> -> vector<16x128xf32>
    %c0_13 = arith.constant 0 : index
    %c0_14 = arith.constant 0 : index
    %36 = vector.load %arg3[%c0_13, %c0_14] : memref<1x128xf32, #tpu.memory_space<vmem>>, vector<1x128xf32>
    %37 = vector.broadcast %36 : vector<1x128xf32> to vector<16x128xf32>
    %38 = arith.addf %35, %37 : vector<16x128xf32>
    %cst_15 = arith.constant 0.000000e+00 : f32
    %39 = vector.broadcast %cst_15 : f32 to vector<16x128xf32>
    %40 = arith.cmpf oge, %38, %39 : vector<16x128xf32>
    %cst_16 = arith.constant 0.00999999977 : f32
    %41 = vector.broadcast %cst_16 : f32 to vector<16x128xf32>
    %42 = arith.mulf %41, %38 : vector<16x128xf32>
    %43 = arith.select %40, %38, %42 : vector<16x128xi1>, vector<16x128xf32>
    %c1_i32_17 = arith.constant 1 : i32
    %44 = tpu.dynamic_rotate %43 by %c1_i32_17 dim 0 : vector<16x128xf32>, i32 -> vector<16x128xf32>
    %cst_18 = arith.constant 0.000000e+00 : f32
    %45 = vector.broadcast %cst_18 : f32 to vector<16x128xf32>
    %46 = arith.select %19, %45, %44 : vector<16x128xi1>, vector<16x128xf32>
    %c15_i32_19 = arith.constant 15 : i32
    %47 = tpu.dynamic_rotate %43 by %c15_i32_19 dim 0 : vector<16x128xf32>, i32 -> vector<16x128xf32>
    %cst_20 = arith.constant 0.000000e+00 : f32
    %48 = vector.broadcast %cst_20 : f32 to vector<16x128xf32>
    %49 = arith.select %21, %48, %47 : vector<16x128xi1>, vector<16x128xf32>
    %50 = tpu.concatenate %46, %43, %49 in 1 : vector<16x128xf32>, vector<16x128xf32>, vector<16x128xf32> -> vector<16x384xf32>
    %c0_21 = arith.constant 0 : index
    %c0_22 = arith.constant 0 : index
    %51 = vector.load %arg4[%c0_21, %c0_22] : memref<384x128xf32, #tpu.memory_space<vmem>>, vector<384x128xf32>
    %cst_23 = arith.constant dense<0.000000e+00> : vector<16x128xf32>
    %52 = tpu.matmul %50, %51, %cst_23 {dimension_numbers = #tpu.dot_dimension_numbers<[1], [0], [0], [1], [0, 0, 1, 1], [], []>} : vector<16x384xf32>, vector<384x128xf32>, vector<16x128xf32> -> vector<16x128xf32>
    %c0_24 = arith.constant 0 : index
    %c0_25 = arith.constant 0 : index
    %53 = vector.load %arg5[%c0_24, %c0_25] : memref<1x128xf32, #tpu.memory_space<vmem>>, vector<1x128xf32>
    %54 = vector.broadcast %53 : vector<1x128xf32> to vector<16x128xf32>
    %55 = arith.addf %52, %54 : vector<16x128xf32>
    %56 = arith.addf %55, %0 : vector<16x128xf32>
    %c0_26 = arith.constant 0 : index
    %c0_27 = arith.constant 0 : index
    %57 = vector.load %arg6[%c0_26, %c0_27] : memref<16x128xf32, #tpu.memory_space<vmem>>, vector<16x128xf32>
    tpu.vector_store %arg6[%c0_26, %c0_27], %56 {strides = array<i32>} : memref<16x128xf32, #tpu.memory_space<vmem>>, vector<16x128xf32>,
    return
  }
  func.func @transform_0(%arg0: i32) -> (i32, i32) {
    %c0_i32 = arith.constant 0 : i32
    %c0_i32_0 = arith.constant 0 : i32
    return %arg0, %c0_i32 : i32, i32
  }
  func.func @transform_1(%arg0: i32) -> (i32, i32) {
    %c0_i32 = arith.constant 0 : i32
    %c0_i32_0 = arith.constant 0 : i32
    %c0_i32_1 = arith.constant 0 : i32
    return %c0_i32, %c0_i32_0 : i32, i32
  }
  func.func @transform_2(%arg0: i32) -> (i32, i32) {
    %c0_i32 = arith.constant 0 : i32
    %c0_i32_0 = arith.constant 0 : i32
    %c0_i32_1 = arith.constant 0 : i32
    return %c0_i32, %c0_i32_0 : i32, i32
  }
  func.func @transform_3(%arg0: i32) -> (i32, i32) {
    %c0_i32 = arith.constant 0 : i32
    %c0_i32_0 = arith.constant 0 : i32
    %c0_i32_1 = arith.constant 0 : i32
    return %c0_i32, %c0_i32_0 : i32, i32
  }
  func.func @transform_4(%arg0: i32) -> (i32, i32) {
    %c0_i32 = arith.constant 0 : i32
    %c0_i32_0 = arith.constant 0 : i32
    %c0_i32_1 = arith.constant 0 : i32
    return %c0_i32, %c0_i32_0 : i32, i32
  }
  func.func @transform_5(%arg0: i32) -> (i32, i32) {
    %c0_i32 = arith.constant 0 : i32
    %c0_i32_0 = arith.constant 0 : i32
    return %arg0, %c0_i32 : i32, i32
  }
}

</mosaic_0001>

<bundles_post_ra>
// kernel: tpu_custom_call.1
= control target key start
LH: loop header
LB: loop body
LE: loop exit
PB: predicated region body
PF: predicated region fallthrough
CT: control target
= control target key end

     0   :  { %10 = vsyncpa [#allocation3], 0  ;;  %s1599_s0 = inlined_call_operand.hbm [shape: f32[32,128], index: 0, kind: input, shape index: {}]   ;;  %s1600_s1 = inlined_call_operand.hbm [shape: f32[384,128], index: 1, kind: input, shape index: {}]   ;;  %s1601_s2 = inlined_call_operand.vmem [shape: f32[1,128], index: 2, kind: input, shape index: {}]   ;;  %s1602_s3 = inlined_call_operand.hbm [shape: f32[384,128], index: 3, kind: input, shape index: {}]   ;;  %s1603_s4 = inlined_call_operand.vmem [shape: f32[1,128], index: 4, kind: input, shape index: {}]   ;;  %s1604_s5 = inlined_call_operand.hbm [shape: f32[32,128], index: 5, kind: output, shape index: {}]  }
   0x1   :  { %12 = vsyncpa [#allocation3 + $0x1], 0 }
   0x2   :  { %13 = vsyncpa [#allocation6], 0 }
   0x3   :  { %14 = vsyncpa [#allocation4], 0 }
   0x4   :  { %16 = vsyncpa [#allocation4 + $0x1], 0  ;;  %s1338_s18 = smov 0   ;;  %s1340_s19 = smov 0  }
   0x5   :  { %s1342_s20 = smov 0   ;;  %s1344_s21 = smov 0  }
   0x6 LB: > { %s1359_s22 = sadd.s32 4294967295, %s1298_s21   ;;  %s865_s23 = sadd.s32 4294967294, %s1298_s21   ;;  %s1298_s21 = sphi %s1344_s21, %s1631_s21   ;;  %s1294_s20 = sphi %s1342_s20, %s1630_s20   ;;  %s1290_s19 = sphi %s1340_s19, %s1629_s19   ;;  %s1286_s18 = sphi %s1338_s18, %s1628_s18  }
   0x7   : > { %p42_p0 = scmp.ne.s32.totalorder %s1290_s19, %s1286_s18  ;;  %p1605_p1 = scmp.eq.s32.totalorder %s1359_s22, 0 }
   0x8   : > { %p150_p2 = scmp.eq.s32.totalorder %s1359_s22, 1  ;;  %p156_p3 = scmp.eq.s32.totalorder %s865_s23, 1 }
   0x9   : > { %p1368_p4 = por %p1605_p1, %p42_p0  ;;  %p866_p5 = scmp.ge.s32.totalorder %s1298_s21, 1 }
   0xa   : > { %p1373_p6 = por %p156_p3, %p42_p0  ;;  %p163_p7 = scmp.lt.s32.totalorder %s1298_s21, 3 }
   0xb   : > { %s1610_s24 = scalar_select %p1368_p4, 1, 0 }
   0xc   : > { %s1611_s25 = scalar_select %p1373_p6, 1, 0 }
   0xd   : > { %p1378_p8 = pnand %p866_p5, %p163_p7  ;;  %s1300_s27 = smov [#allocation5]  }
   0xe   : > { %s175_s28 = sshll.u32 %s1300_s27, 4  ;;  %s1301_s30 = smov [#allocation7]   ;;  %s176_s28 = int_to_ptr.vmem [resolvable:$true] %s175_s28 }
   0xf   : > { %s1612_s26 = scalar_select %p1378_p8, 1, 0 }
  0x10   : > { %p1091_p9 = pneg %p1378_p8  ;;  %s191_s6 = sshll.u32 %s1301_s30, 4  ;;  %s192_s6 = int_to_ptr.vmem [resolvable:$true] %s191_s6 }
  0x11   : > { %s1161_s7 = scalar_lea.vmem %s176_s28, 6144  ;;  %p1169_p5 = scmp.lt.s32.totalorder %s176_s28, %s176_s28 }
  0x12   : > { %p1387_p11 = pnand %p1091_p9, %p1605_p1  ;;  %p1162_p13 = scmp.ne.s32.totalorder %s176_s28, %s1161_s7 }
  0x13   : > { %p1170_p7 = scmp.lt.s32.totalorder %s1161_s7, %s1161_s7 }
  0x14   : > { %p1152_p12 = pneg %p1387_p11 }
  0x15   : > { %p1171_p10 = por %p1170_p7, %p1169_p5 }
  0x16   : > { %p1164_p0 = pnand %p1162_p13, %p1152_p12 }
  0x18   : > { %p1165_p3 = pneg %p1164_p0 }
  0x1a   : > { %p1172_p9 = pnand %p1171_p10, %p1165_p3 }
  0x1c   : > { %1175 = shalt.err (!%p1172_p9)
}
  0x1d   : > { %s1606_s8 = smov 128   ;;  %s1303_s9 = smov 8  }
  0x1e   : > { %1094 = dma.hbm_to_vmem [thread:$0]  (!%p1387_p11), %s1600_s1, 6144, %s176_s28, [#allocation6], %s1606_s8, %s1606_s8, %s1303_s9  }
  0x1f   : > { %s1187_s12 = scalar_lea.vmem %s192_s6, 6144  ;;  %p1195_p10 = scmp.lt.s32.totalorder %s192_s6, %s192_s6 }
  0x20   : > { %p1188_p13 = scmp.ne.s32.totalorder %s192_s6, %s1187_s12  ;;  %p1196_p3 = scmp.lt.s32.totalorder %s1187_s12, %s1187_s12 }
  0x22   : > { %p1190_p0 = pnand %p1188_p13, %p1152_p12  ;;  %p1197_p7 = por %p1196_p3, %p1195_p10 }
  0x24   : > { %p1191_p5 = pneg %p1190_p0 }
  0x26   : > { %p1198_p9 = pnand %p1197_p7, %p1191_p5 }
  0x28   : > { %1201 = shalt.err (!%p1198_p9)
}
  0x29   : > { %1097 = dma.hbm_to_vmem [thread:$0]  (!%p1387_p11), %s1602_s3, 6144, %s192_s6, [#allocation6], %s1606_s8, %s1606_s8, %s1303_s9  }
  0x2a   : > { %s1416_s15 = sadd.s32 1, %s1298_s21   ;;  %s29_s16 = sadd.s32 1, %s1294_s20 }
  0x2b   : > { %s26_s17 = ssub.s32 %s1298_s21, %s1416_s15  ;;  %p36_p12 = scmp.ne.s32.totalorder %s1294_s20, %s1290_s19 }
  0x2c   : > { %p27_p13 = scmp.eq.s32.totalorder %s26_s17, 0  ;;  %p37_p0 = scmp.eq.s32.totalorder %s1298_s21, 0 }
  0x2d   : > { %p1426_p5 = por %p150_p2, %p36_p12  ;;  %p1108_p10 = scmp.lt.s32.totalorder %s1298_s21, 2 }
  0x2e   : > { %s1432_s27 = scalar_select %p27_p13, %s1294_s20, %s29_s16  }
  0x2f   : > { %s1614_s23 = scalar_select %p1426_p5, 1, 0 }
  0x30   : > { %p38_p3 = por %p37_p0, %p36_p12  ;;  %s208_s28 = sand.u32 1, %s1294_s20  }
  0x31   : > { %s870_s29 = sshll.u32 %s208_s28, 4  ;;  %s893_s30 = sshll.u32 %s1298_s21, 8 }
  0x32   : > { %s1439_s10 = scalar_lea.hbm %s1599_s0, %s893_s30  ;;  %s212_s11 = scalar_lea.vmem [#allocation2], %s870_s29 }
  0x33   : > { %s219_s12 = sshll.u32 %s212_s11, 4  ;;  %p1443_p2 = pnand %p1108_p10, %p38_p3  ;;  %s1441_s12 = int_to_ptr.vmem [resolvable:$true] %s219_s12 }
  0x34   : > { %s1447_s14 = scalar_lea.sflag [#allocation3], %s208_s28  ;;  %s1202_s16 = scalar_lea.hbm %s1439_s10, 256 }
  0x35   : > { %p1203_p11 = scmp.ne.s32.totalorder %s1439_s10, %s1202_s16  ;;  %p1204_p7 = pneg %p1443_p2 }
  0x36   : > { %s1207_s29 = scalar_lea.hbm %s1599_s0, 512  ;;  %p1208_p13 = scmp.lt.s32.totalorder %s1439_s10, %s1599_s0 }
  0x37   : > { %p1205_p9 = pnand %p1204_p7, %p1203_p11  ;;  %p1209_p0 = scmp.lt.s32.totalorder %s1207_s29, %s1202_s16 }
  0x39   : > { %p1206_p12 = pneg %p1205_p9  ;;  %p1210_p10 = por %p1209_p0, %p1208_p13 }
  0x3b   : > { %p1211_p3 = pnand %p1210_p10, %p1206_p12 }
  0x3d   : > { %1214 = shalt.err (!%p1211_p3)
}
  0x3e   : > { %s1215_s28 = scalar_lea.vmem %s1441_s12, 256  ;;  %s1304_s11 = smov [#allocation2]  }
  0x3f   : > { %p1216_p1 = scmp.ne.s32.totalorder %s1441_s12, %s1215_s28  ;;  %s1220_s8 = sshll.u32 %s1304_s11, 4  ;;  %s1221_s8 = int_to_ptr.vmem [resolvable:$false] %s1220_s8 }
  0x40   : > { %s1222_s17 = scalar_lea.vmem %s1221_s8, 512  ;;  %p1223_p9 = scmp.lt.s32.totalorder %s1441_s12, %s1221_s8 }
  0x41   : > { %p1218_p6 = pnand %p1216_p1, %p1204_p7  ;;  %p1224_p5 = scmp.lt.s32.totalorder %s1222_s17, %s1215_s28 }
  0x43   : > { %p1219_p11 = pneg %p1218_p6  ;;  %p1225_p4 = por %p1224_p5, %p1223_p9 }
  0x45   : > { %p1226_p8 = pnand %p1225_p4, %p1219_p11 }
  0x47   : > { %1229 = shalt.err (!%p1226_p8)
}
  0x48   : > { %s1616_s16 = smov 128   ;;  %p1617_p1 = scmp.ne.s32.totalorder %s1612_s26, 0 }
  0x49   : > { %1101 = dma.hbm_to_vmem [thread:$0]  (!%p1443_p2), %s1439_s10, 256, %s1441_s12, %s1447_s14, %s1616_s16, %s1616_s16, %s1303_s9  }
  0x4a   : > { %231 = sbr.rel (%p1617_p1) target bundleno = 549 (0x225), region = 40  ;;  %s1474_s30 = sand.u32 (!%p1617_p1), 1, %s1290_s19  }
  0x4b   : > { %s874_s8 = sshll.u32 (!%p1617_p1), %s1474_s30, 4  ;;  %s234_s29 = scalar_lea.sflag (!%p1617_p1), [#allocation3], %s1474_s30 }
  0x4c   : > { %s1480_s13 = scalar_lea.vmem (!%p1617_p1), [#allocation2], %s874_s8  ;;  %p1618_p4 = scmp.ne.s32.totalorder (!%p1617_p1), %s1610_s24, 0 }
  0x4f   : > { %1273 = dma.done.wait (%p1618_p4), %s234_s29, 256  }
  0x50   : > { %1275 = vsyncadd (%p1618_p4), %s234_s29, 4294967040  ;;  %p1619_p6 = scmp.eq.s32.totalorder %s1359_s22, 0 }
  0x52   : > { %1277 = dma.done.wait (%p1619_p6), [#allocation6], 12288   ;;  %p1620_p8 = pmov %p1619_p6 }
  0x53   : > { %v358_v0 = vld [vmem:[#allocation5 + $0xf8] sm:$0xff]  ;;  %v357_v2 = vld [vmem:[#allocation5 + $0xf0] sm:$0xff]  ;;  %v356_v5 = vld [vmem:[#allocation5 + $0xe8] sm:$0xff]  ;;  %v276_v33 = vlaneseq  ;;  %s271_s12 = scalar_lea.vmem [#allocation8], %s874_s8  ;;  %s894_s6 = sshll.u32 %s1359_s22, 8 }
  0x54   : > { %1279 = vsyncadd (%p1620_p8), [#allocation6], 4294955008  ;;  %v342_v1 = vld [vmem:[#allocation5 + $0x78] sm:$0xff]  ;;  %897 = vmatprep.subr.mxu0 %v358_v0  ;;  %v341_v3 = vld [vmem:[#allocation5 + $0x70] sm:$0xff]  ;;  %s773_s14 = sshll.u32 %s271_s12, 4  ;;  %s1555_s11 = scalar_lea.hbm %s1604_s5, %s894_s6  ;;  %s1550_s14 = int_to_ptr.vmem [resolvable:$true] %s773_s14 }
  0x55   : > { %v374_v4 = vld [vmem:[#allocation5 + $0x178] sm:$0xff]  ;;  %898 = vmatpush3.msra.mxu0 %v342_v1  ;;  %v373_v6 = vld [vmem:[#allocation5 + $0x170] sm:$0xff]  ;;  %v340_v7 = vld [vmem:[#allocation5 + $0x68] sm:$0xff]  ;;  %v1500_v42 = vshrl.u32 %v276_v33, 7  ;;  %s760_s17 = scalar_lea.sflag [#allocation4], %s1474_s30  ;;  %s1230_s16 = scalar_lea.vmem %s1550_s14, 256 }
  0x56   : > { %1009 = vmatprep.subr.mxu1 %v374_v4  ;;  %899 = vmatprep.subr.mxu0 %v357_v2  ;;  %v372_v8 = vld [vmem:[#allocation5 + $0x168] sm:$0xff]  ;;  %v355_v9 = vld [vmem:[#allocation5 + $0xe0] sm:$0xff]  ;;  %v354_v12 = vld [vmem:[#allocation5 + $0xd8] sm:$0xff]  ;;  %p1231_p5 = scmp.ne.s32.totalorder %s1550_s14, %s1230_s16  ;;  %p1625_p2 = scmp.ne.s32.totalorder %s1614_s23, 0 }
  0x57   : > { %1010 = vmatpush3.msra.mxu1 %v374_v4  ;;  %900 = vmatpush3.msra.mxu0 %v341_v3  ;;  %v339_v10 = vld [vmem:[#allocation5 + $0x60] sm:$0xff]  ;;  %v338_v13 = vld [vmem:[#allocation5 + $0x58] sm:$0xff]  ;;  %v353_v15 = vld [vmem:[#allocation5 + $0xd0] sm:$0xff]  ;;  %v278_v50 = vadd.s32 8, %v1500_v42  ;;  %v283_v53 = vand.u32 15, %v1500_v42  ;;  %vm315_vm2 = vcmp.lt.s32.totalorder %v1500_v42, 1 }
  0x58   : > { %1011 = vmatprep.subr.mxu1 %v373_v6  ;;  %901 = vmatprep.subr.mxu0 %v356_v5  ;;  %v371_v11 = vld [vmem:[#allocation5 + $0x160] sm:$0xff]  ;;  %v370_v14 = vld [vmem:[#allocation5 + $0x158] sm:$0xff]  ;;  %v337_v16 = vld [vmem:[#allocation5 + $0x50] sm:$0xff]  ;;  %vm322_vm3 = vcmp.lt.s32.totalorder %v1500_v42, 7  ;;  %p1232_p7 = pnand %p1231_p5, %p1625_p2  ;;  %s1305_s22 = smov [#allocation8]  }
  0x59   : > { %1012 = vmatpush3.msra.mxu1 %v373_v6  ;;  %902 = vmatpush3.msra.mxu0 %v340_v7  ;;  %v369_v17 = vld [vmem:[#allocation5 + $0x150] sm:$0xff]  ;;  %v352_v18 = vld [vmem:[#allocation5 + $0xc8] sm:$0xff]  ;;  %v351_v21 = vld [vmem:[#allocation5 + $0xc0] sm:$0xff]  ;;  %v290_v61 = vand.u32 15, %v278_v50  ;;  %vm1510_vm4 = vcmp.ne.s32.totalorder %v283_v53, 0  ;;  %s1234_s8 = sshll.u32 %s1305_s22, 4  ;;  %s1235_s8 = int_to_ptr.vmem [resolvable:$false] %s1234_s8 }
  0x5a   : > { %1013 = vmatprep.subr.mxu1 %v372_v8  ;;  %903 = vmatprep.subr.mxu0 %v355_v9  ;;  %v336_v19 = vld [vmem:[#allocation5 + $0x48] sm:$0xff]  ;;  %v335_v22 = vld [vmem:[#allocation5 + $0x40] sm:$0xff]  ;;  %v350_v24 = vld [vmem:[#allocation5 + $0xb8] sm:$0xff]  ;;  %p1233_p12 = pneg %p1232_p7  ;;  %s1236_s29 = scalar_lea.vmem %s1235_s8, 512 }
  0x5b   : > { %1014 = vmatpush3.msra.mxu1 %v372_v8  ;;  %904 = vmatpush3.msra.mxu0 %v339_v10  ;;  %v368_v20 = vld [vmem:[#allocation5 + $0x148] sm:$0xff]  ;;  %v367_v23 = vld [vmem:[#allocation5 + $0x140] sm:$0xff]  ;;  %v334_v25 = vld [vmem:[#allocation5 + $0x38] sm:$0xff]  ;;  %vm1520_vm5 = vcmp.ne.s32.totalorder %v290_v61, 15  ;;  %p1237_p13 = scmp.lt.s32.totalorder %s1550_s14, %s1235_s8  ;;  %p1238_p0 = scmp.lt.s32.totalorder %s1236_s29, %s1230_s16 }
  0x5c   : > { %1015 = vmatprep.subr.mxu1 %v371_v11  ;;  %905 = vmatprep.subr.mxu0 %v354_v12  ;;  %v366_v26 = vld [vmem:[#allocation5 + $0x138] sm:$0xff]  ;;  %v349_v27 = vld [vmem:[#allocation5 + $0xb0] sm:$0xff]  ;;  %v348_v32 = vld [vmem:[#allocation5 + $0xa8] sm:$0xff] }
  0x5d   : > { %1016 = vmatpush3.msra.mxu1 %v371_v11  ;;  %906 = vmatpush3.msra.mxu0 %v338_v13  ;;  %v1491_v28 = vld [vmem:[%s1480_s13] sm:$0xff]  ;;  %v1494_v29 = vld [vmem:[%s1480_s13 + $0x8] sm:$0xff]  ;;  %p1239_p10 = por %p1238_p0, %p1237_p13 }
  0x5e   : > { %1017 = vmatprep.subr.mxu1 %v370_v14  ;;  %907 = vmatprep.subr.mxu0 %v353_v15  ;;  %v333_v30 = vld [vmem:[#allocation5 + $0x30] sm:$0xff]  ;;  %v332_v34 = vld [vmem:[#allocation5 + $0x28] sm:$0xff]  ;;  %v309_v36 = vmul.f32 0.01, %v1491_v28  ;;  %v310_v37 = vmul.f32 0.01, %v1494_v29 }
  0x5f   : > { %1018 = vmatpush3.msra.mxu1 %v370_v14  ;;  %908 = vmatpush3.msra.mxu0 %v337_v16  ;;  %v365_v31 = vld [vmem:[#allocation5 + $0x130] sm:$0xff]  ;;  %v364_v35 = vld [vmem:[#allocation5 + $0x128] sm:$0xff]  ;;  %v347_v38 = vld [vmem:[#allocation5 + $0xa0] sm:$0xff]  ;;  %vm307_vm0 = vcmp.ge.f32.partialorder %v1491_v28, 0.0  ;;  %vm308_vm1 = vcmp.ge.f32.partialorder %v1494_v29, 0.0  ;;  %p1240_p3 = pnand %p1239_p10, %p1233_p12 }
  0x60   : > { %1019 = vmatprep.subr.mxu1 %v369_v17  ;;  %909 = vmatprep.subr.mxu0 %v352_v18  ;;  %v331_v39 = vld [vmem:[#allocation5 + $0x20] sm:$0xff]  ;;  %v346_v41 = vld [vmem:[#allocation5 + $0x98] sm:$0xff]  ;;  %v311_v45 = vsel %vm307_vm0, %v1491_v28, %v309_v36  ;;  %v312_v46 = vsel %vm308_vm1, %v1494_v29, %v310_v37  ;;  %v345_v47 = vld [vmem:[#allocation5 + $0x90] sm:$0xff] }
  0x61   : > { %1020 = vmatpush3.msra.mxu1 %v369_v17  ;;  %910 = vmatpush3.msra.mxu0 %v336_v19  ;;  %v363_v40 = vld [vmem:[#allocation5 + $0x120] sm:$0xff]  ;;  %v330_v43 = vld [vmem:[#allocation5 + $0x18] sm:$0xff]  ;;  %v329_v48 = vld [vmem:[#allocation5 + $0x10] sm:$0xff]  ;;  %v313_v52 = vrot.slane %v311_v45, 7  ;;  %v314_v54 = vrot.slane %v312_v46, 7  ;;  %v320_v57 = vrot.slane %v311_v45, 1 }
  0x62   : > { %1021 = vmatprep.subr.mxu1 %v368_v20  ;;  %911 = vmatprep.subr.mxu0 %v351_v21  ;;  %v362_v44 = vld [vmem:[#allocation5 + $0x118] sm:$0xff]  ;;  %v361_v49 = vld [vmem:[#allocation5 + $0x110] sm:$0xff]  ;;  %v344_v51 = vld [vmem:[#allocation5 + $0x88] sm:$0xff]  ;;  %v321_v59 = vrot.slane %v312_v46, 1 }
  0x63   : > { %1022 = vmatpush3.msra.mxu1 %v368_v20  ;;  %912 = vmatpush3.msra.mxu0 %v335_v22  ;;  %v328_v55 = vld [vmem:[#allocation5 + $0x8] sm:$0xff]  ;;  %v343_v56 = vld [vmem:[#allocation5 + $0x80] sm:$0xff]  ;;  %v317_v62 = vsel %vm315_vm2, %v314_v54, %v313_v52  ;;  %v581_v2 = vld [vmem:[#allocation7 + $0xf8] sm:$0xff]  ;;  %v316_v6 = vsel %vm315_vm2, %v313_v52, %v314_v54 }
  0x64   : > { %1023 = vmatprep.subr.mxu1 %v367_v23  ;;  %913 = vmatprep.subr.mxu0 %v350_v24  ;;  %v360_v58 = vld [vmem:[#allocation5 + $0x108] sm:$0xff]  ;;  %v327_v60 = vld [vmem:[#allocation5] sm:$0xff]  ;;  %v323_v1 = vsel %vm322_vm3, %v320_v57, %v321_v59  ;;  %v324_v3 = vsel %vm322_vm3, %v321_v59, %v320_v57  ;;  %v565_v5 = vld [vmem:[#allocation7 + $0x78] sm:$0xff] }
  0x65   : > { %1024 = vmatpush3.msra.mxu1 %v367_v23  ;;  %914 = vmatpush3.msra.mxu0 %v334_v25  ;;  %v359_v0 = vld [vmem:[#allocation5 + $0x100] sm:$0xff]  ;;  %v597_v7 = vld [vmem:[#allocation7 + $0x178] sm:$0xff]  ;;  %v580_v8 = vld [vmem:[#allocation7 + $0xf0] sm:$0xff] }
  0x66   : > { %1025 = vmatprep.subr.mxu1 %v366_v26  ;;  %915 = vmatprep.subr.mxu0 %v349_v27  ;;  %v564_v9 = vld [vmem:[#allocation7 + $0x70] sm:$0xff]  ;;  %v579_v11 = vld [vmem:[#allocation7 + $0xe8] sm:$0xff]  ;;  %v578_v14 = vld [vmem:[#allocation7 + $0xe0] sm:$0xff] }
  0x67   : > { %1026 = vmatpush3.msra.mxu1 %v366_v26  ;;  %916 = vmatpush3.msra.mxu0 %v333_v30  ;;  %v596_v10 = vld [vmem:[#allocation7 + $0x170] sm:$0xff]  ;;  %v563_v12 = vld [vmem:[#allocation7 + $0x68] sm:$0xff]  ;;  %v562_v15 = vld [vmem:[#allocation7 + $0x60] sm:$0xff] }
  0x68   : > { %1027 = vmatprep.subr.mxu1 %v365_v31  ;;  %917 = vmatprep.subr.mxu0 %v348_v32  ;;  %v595_v13 = vld [vmem:[#allocation7 + $0x168] sm:$0xff]  ;;  %v594_v16 = vld [vmem:[#allocation7 + $0x160] sm:$0xff]  ;;  %v577_v17 = vld [vmem:[#allocation7 + $0xd8] sm:$0xff] }
  0x69   : > { %1028 = vmatpush3.msra.mxu1 %v365_v31  ;;  %918 = vmatpush3.msra.mxu0 %v332_v34  ;;  %v561_v18 = vld [vmem:[#allocation7 + $0x58] sm:$0xff]  ;;  %v576_v20 = vld [vmem:[#allocation7 + $0xd0] sm:$0xff]  ;;  %v575_v23 = vld [vmem:[#allocation7 + $0xc8] sm:$0xff] }
  0x6a   : > { %1029 = vmatprep.subr.mxu1 %v364_v35  ;;  %919 = vmatprep.subr.mxu0 %v347_v38  ;;  %v593_v19 = vld [vmem:[#allocation7 + $0x158] sm:$0xff]  ;;  %v560_v21 = vld [vmem:[#allocation7 + $0x50] sm:$0xff]  ;;  %v559_v24 = vld [vmem:[#allocation7 + $0x48] sm:$0xff] }
  0x6b   : > { %1030 = vmatpush3.msra.mxu1 %v364_v35  ;;  %920 = vmatpush3.msra.mxu0 %v331_v39  ;;  %v592_v22 = vld [vmem:[#allocation7 + $0x150] sm:$0xff]  ;;  %v591_v25 = vld [vmem:[#allocation7 + $0x148] sm:$0xff]  ;;  %v574_v26 = vld [vmem:[#allocation7 + $0xc0] sm:$0xff] }
  0x6c   : > { %1031 = vmatprep.subr.mxu1 %v363_v40  ;;  %921 = vmatprep.subr.mxu0 %v346_v41  ;;  %v558_v27 = vld [vmem:[#allocation7 + $0x40] sm:$0xff]  ;;  %v573_v31 = vld [vmem:[#allocation7 + $0xb8] sm:$0xff]  ;;  %v572_v34 = vld [vmem:[#allocation7 + $0xb0] sm:$0xff] }
  0x6d   : > { %1032 = vmatpush3.msra.mxu1 %v363_v40  ;;  %922 = vmatpush3.msra.mxu0 %v330_v43  ;;  %v590_v30 = vld [vmem:[#allocation7 + $0x140] sm:$0xff]  ;;  %v557_v32 = vld [vmem:[#allocation7 + $0x38] sm:$0xff]  ;;  %v556_v35 = vld [vmem:[#allocation7 + $0x30] sm:$0xff] }
  0x6e   : > { %1033 = vmatprep.subr.mxu1 %v362_v44  ;;  %923 = vmatprep.subr.mxu0 %v345_v47  ;;  %v589_v33 = vld [vmem:[#allocation7 + $0x138] sm:$0xff]  ;;  %v588_v36 = vld [vmem:[#allocation7 + $0x130] sm:$0xff]  ;;  %v571_v37 = vld [vmem:[#allocation7 + $0xa8] sm:$0xff] }
  0x6f   : > { %1034 = vmatpush3.msra.mxu1 %v362_v44  ;;  %924 = vmatpush3.msra.mxu0 %v329_v48  ;;  %v555_v38 = vld [vmem:[#allocation7 + $0x28] sm:$0xff]  ;;  %v570_v40 = vld [vmem:[#allocation7 + $0xa0] sm:$0xff]  ;;  %v569_v44 = vld [vmem:[#allocation7 + $0x98] sm:$0xff] }
  0x70   : > { %1035 = vmatprep.subr.mxu1 %v361_v49  ;;  %925 = vmatprep.subr.mxu0 %v344_v51  ;;  %v587_v39 = vld [vmem:[#allocation7 + $0x128] sm:$0xff]  ;;  %v554_v41 = vld [vmem:[#allocation7 + $0x20] sm:$0xff]  ;;  %v568_v47 = vld [vmem:[#allocation7 + $0x90] sm:$0xff] }
  0x71   : > { %446 = vmatprep.mubr.f32.mxu0 %v311_v45  ;;  %926 = vmatpush3.msra.mxu0 %v328_v55  ;;  %v586_v43 = vld [vmem:[#allocation7 + $0x120] sm:$0xff]  ;;  %v553_v45 = vld [vmem:[#allocation7 + $0x18] sm:$0xff]  ;;  %v552_v48 = vld [vmem:[#allocation7 + $0x10] sm:$0xff] }
  0x72   : > { %1036 = vmatpush3.msra.mxu1 %v361_v49  ;;  %927 = vmatprep.subr.mxu0 %v343_v56  ;;  %v584_v49 = vld [vmem:[#allocation7 + $0x110] sm:$0xff]  ;;  %v567_v50 = vld [vmem:[#allocation7 + $0x88] sm:$0xff]  ;;  %v566_v53 = vld [vmem:[#allocation7 + $0x80] sm:$0xff] }
  0x73   : > { %1037 = vmatprep.subr.mxu1 %v360_v58  ;;  %928 = vmatpush3.msra.mxu0 %v327_v60  ;;  %v551_v51 = vld [vmem:[#allocation7 + $0x8] sm:$0xff]  ;;  %v550_v54 = vld [vmem:[#allocation7] sm:$0xff] }
  0x74   : > { %1038 = vmatpush3.msra.mxu1 %v360_v58  ;;  %880 = vmatmul.mubr.msk.f32.vlgmr.msra.gmra.mxu0 %vm1510_vm4, %v317_v62  ;;  %v583_v52 = vld [vmem:[#allocation7 + $0x108] sm:$0xff]  ;;  %v582_v55 = vld [vmem:[#allocation7 + $0x100] sm:$0xff] }
  0x75   : > { %1039 = vmatprep.subr.mxu1 %v359_v0  ;;  %451 = vmatprep.mubr.f32.mxu0 %v312_v46  ;;  %v585_v46 = vld [vmem:[#allocation7 + $0x118] sm:$0xff]  ;;  %v878_v58 = vld [vmem:[%s1601_s2] ss:$0 sm:$0xff] }
  0x76   : > { %1040 = vmatpush3.msra.mxu1 %v359_v0  ;;  %1041 = vmatprep.mubr.f32.mxu1 %v323_v1 }
  0x77   : > { %953 = vmatprep.subr.mxu0 %v581_v2  ;;  %1042 = vmatmul.mubr.msk.f32.vlgmr.msra.gmra.mxu1 %vm1520_vm5, %v324_v3 }
  0x78   : > { %954 = vmatpush3.msra.mxu0 %v565_v5  ;;  %1044 = vmatprep.subr.mxu1 %v597_v7 }
  0x79   : > { %452 = vmatmul.mubr.f32.gmra.mxu0 %v316_v6  ;;  %955 = vmatprep.subr.mxu0 %v580_v8 }
  0x7a   : > { %1045 = vmatpush3.msra.mxu1 %v597_v7  ;;  %956 = vmatpush3.msra.mxu0 %v564_v9 }
  0x7b   : > { %1046 = vmatprep.subr.mxu1 %v596_v10  ;;  %957 = vmatprep.subr.mxu0 %v579_v11 }
  0x7c   : > { %1047 = vmatpush3.msra.mxu1 %v596_v10  ;;  %958 = vmatpush3.msra.mxu0 %v563_v12 }
  0x7d   : > { %1048 = vmatprep.subr.mxu1 %v595_v13  ;;  %959 = vmatprep.subr.mxu0 %v578_v14 }
  0x7e   : > { %1049 = vmatpush3.msra.mxu1 %v595_v13  ;;  %960 = vmatpush3.msra.mxu0 %v562_v15 }
  0x7f   : > { %1050 = vmatprep.subr.mxu1 %v594_v16  ;;  %961 = vmatprep.subr.mxu0 %v577_v17 }
  0x80   : > { %1051 = vmatpush3.msra.mxu1 %v594_v16  ;;  %962 = vmatpush3.msra.mxu0 %v561_v18 }
  0x81   : > { %1052 = vmatprep.subr.mxu1 %v593_v19  ;;  %963 = vmatprep.subr.mxu0 %v576_v20 }
  0x82   : > { %1053 = vmatpush3.msra.mxu1 %v593_v19  ;;  %964 = vmatpush3.msra.mxu0 %v560_v21 }
  0x83   : > { %1054 = vmatprep.subr.mxu1 %v592_v22  ;;  %965 = vmatprep.subr.mxu0 %v575_v23 }
  0x84   : > { %1055 = vmatpush3.msra.mxu1 %v592_v22  ;;  %966 = vmatpush3.msra.mxu0 %v559_v24  ;;  %v883_v22 = vld [vmem:[%s1603_s4] ss:$0 sm:$0xff] }
  0x85   : > { %1056 = vmatprep.subr.mxu1 %v591_v25  ;;  %967 = vmatprep.subr.mxu0 %v574_v26 }
  0x86   : > { %1057 = vmatpush3.msra.mxu1 %v591_v25  ;;  %968 = vmatpush3.msra.mxu0 %v558_v27 }
  0x87   : > { %1058 = vmatprep.subr.mxu1 %v590_v30  ;;  %969 = vmatprep.subr.mxu0 %v573_v31 }
  0x88   : > { %1059 = vmatpush3.msra.mxu1 %v590_v30  ;;  %970 = vmatpush3.msra.mxu0 %v557_v32 }
  0x89   : > { %1060 = vmatprep.subr.mxu1 %v589_v33  ;;  %971 = vmatprep.subr.mxu0 %v572_v34 }
  0x8a   : > { %1061 = vmatpush3.msra.mxu1 %v589_v33  ;;  %972 = vmatpush3.msra.mxu0 %v556_v35 }
  0x8b   : > { %1062 = vmatprep.subr.mxu1 %v588_v36  ;;  %973 = vmatprep.subr.mxu0 %v571_v37 }
  0x8c   : > { %1063 = vmatpush3.msra.mxu1 %v588_v36  ;;  %974 = vmatpush3.msra.mxu0 %v555_v38 }
  0x8d   : > { %1064 = vmatprep.subr.mxu1 %v587_v39  ;;  %975 = vmatprep.subr.mxu0 %v570_v40 }
  0x8e   : > { %1065 = vmatpush3.msra.mxu1 %v587_v39  ;;  %976 = vmatpush3.msra.mxu0 %v554_v41 }
  0x8f   : > { %1066 = vmatprep.subr.mxu1 %v586_v43  ;;  %977 = vmatprep.subr.mxu0 %v569_v44 }
  0x90   : > { %1067 = vmatpush3.msra.mxu1 %v586_v43  ;;  %978 = vmatpush3.msra.mxu0 %v553_v45 }
  0x91   : > { %1068 = vmatprep.subr.mxu1 %v585_v46  ;;  %979 = vmatprep.subr.mxu0 %v568_v47 }
  0x92   : > { %1069 = vmatpush3.msra.mxu1 %v585_v46  ;;  %980 = vmatpush3.msra.mxu0 %v552_v48 }
  0x93   : > { %1070 = vmatprep.subr.mxu1 %v584_v49  ;;  %981 = vmatprep.subr.mxu0 %v567_v50 }
  0x94   : > { %1071 = vmatpush3.msra.mxu1 %v584_v49  ;;  %982 = vmatpush3.msra.mxu0 %v551_v51 }
  0x95   : > { %1072 = vmatprep.subr.mxu1 %v583_v52  ;;  %983 = vmatprep.subr.mxu0 %v566_v53 }
  0x96   : > { %1073 = vmatpush3.msra.mxu1 %v583_v52  ;;  %984 = vmatpush3.msra.mxu0 %v550_v54 }
  0x97   : > { %1074 = vmatprep.subr.mxu1 %v582_v55 }
  0x98   : > { %1075 = vmatpush3.msra.mxu1 %v582_v55 }
 0x134   : > { %v929_v56 = vpop.f32.mrf.mxu0 }
 0x136   : > { %v930_v57 = vpop.f32.mrf.mxu0 }
 0x137   : > { %v931_v59 = vadd.f32 %v930_v57, %v929_v56  ;;  %v1043_v60 = vpop.f32.mrf.mxu1 }
 0x139   : > { %v932_v61 = vpop.f32.mrf.mxu0  ;;  %v449_v62 = vadd.f32 %v931_v59, %v878_v58  ;;  %v523_v0 = vpop.f32.mrf.mxu1 }
 0x13b   : > { %v933_v1 = vpop.f32.mrf.mxu0  ;;  %v524_v3 = vadd.f32 %v523_v0, %v449_v62 }
 0x13c   : > { %v934_v2 = vadd.f32 %v933_v1, %v932_v61 }
 0x13d   : > { %v534_v6 = vmul.f32 0.01, %v524_v3  ;;  %vm532_vm6 = vcmp.ge.f32.partialorder %v524_v3, 0.0 }
 0x13e   : > { %v454_v5 = vadd.f32 %v934_v2, %v878_v58 }
 0x13f   : > { %v536_v8 = vsel %vm532_vm6, %v524_v3, %v534_v6 }
 0x140   : > { %v529_v7 = vadd.f32 %v1043_v60, %v454_v5  ;;  %669 = vmatprep.mubr.f32.mxu0 %v536_v8  ;;  %v538_v12 = vrot.slane %v536_v8, 7  ;;  %v544_v13 = vrot.slane %v536_v8, 1 }
 0x142   : > { %vm533_vm7 = vcmp.ge.f32.partialorder %v529_v7, 0.0  ;;  %v535_v9 = vmul.f32 0.01, %v529_v7 }
 0x144   : > { %v537_v10 = vsel %vm533_vm7, %v529_v7, %v535_v9 }
 0x145   : > { %v539_v11 = vrot.slane %v537_v10, 7  ;;  %v545_v14 = vrot.slane %v537_v10, 1 }
 0x147   : > { %v541_v15 = vsel %vm315_vm2, %v539_v11, %v538_v12  ;;  %v546_v16 = vsel %vm322_vm3, %v544_v13, %v545_v14  ;;  %v547_v17 = vsel %vm322_vm3, %v545_v14, %v544_v13  ;;  %v540_v18 = vsel %vm315_vm2, %v538_v12, %v539_v11 }
 0x148   : > { %885 = vmatmul.mubr.msk.f32.vlgmr.msra.gmra.mxu0 %vm1510_vm4, %v541_v15  ;;  %1076 = vmatprep.mubr.f32.mxu1 %v546_v16 }
 0x149   : > { %674 = vmatprep.mubr.f32.mxu0 %v537_v10  ;;  %1077 = vmatmul.mubr.msk.f32.vlgmr.msra.gmra.mxu1 %vm1520_vm5, %v547_v17 }
 0x14c   : > { %675 = vmatmul.mubr.f32.gmra.mxu0 %v540_v18 }
 0x208   : > { %v985_v19 = vpop.f32.mrf.mxu0 }
 0x209   : > { %v1078_v20 = vpop.f32.mrf.mxu1 }
 0x20a   : > { %v986_v21 = vpop.f32.mrf.mxu0 }
 0x20b   : > { %v987_v63 = vadd.f32 %v986_v21, %v985_v19  ;;  %v746_v25 = vpop.f32.mrf.mxu1 }
 0x20c   : > { %v988_v23 = vpop.f32.mrf.mxu0 }
 0x20d   : > { %v672_v24 = vadd.f32 %v987_v63, %v883_v22 }
 0x20e   : > { %v989_v26 = vpop.f32.mrf.mxu0 }
 0x20f   : > { %v747_v4 = vadd.f32 %v746_v25, %v672_v24  ;;  %v990_v27 = vadd.f32 %v989_v26, %v988_v23 }
 0x211   : > { %v755_v42 = vadd.f32 %v747_v4, %v1491_v28  ;;  %v677_v30 = vadd.f32 %v990_v27, %v883_v22 }
 0x213   : > { %757 = vst [vmem:[%s271_s12] sm:$0xff] %v755_v42  ;;  %v752_v31 = vadd.f32 %v1078_v20, %v677_v30 }
 0x215   : > { %v756_v32 = vadd.f32 %v752_v31, %v1494_v29 }
 0x217   : > { %758 = vst [vmem:[%s271_s12 + $0x8] sm:$0xff] %v756_v32 }
 0x218   : > { %1243 = shalt.err (!%p1240_p3)
}
 0x219   : > { %s1244_s13 = scalar_lea.hbm %s1555_s11, 256  ;;  %s1248_s9 = scalar_lea.hbm %s1604_s5, 512 }
 0x21a   : > { %p1245_p11 = scmp.ne.s32.totalorder %s1555_s11, %s1244_s13  ;;  %p1249_p4 = scmp.lt.s32.totalorder %s1555_s11, %s1604_s5 }
 0x21b   : > { %p1250_p6 = scmp.lt.s32.totalorder %s1248_s9, %s1244_s13 }
 0x21c   : > { %p1246_p9 = pnand %p1245_p11, %p1625_p2 }
 0x21d   : > { %p1251_p8 = por %p1250_p6, %p1249_p4 }
 0x21e   : > { %p1247_p1 = pneg %p1246_p9 }
 0x220   : > { %p1252_p5 = pnand %p1251_p8, %p1247_p1 }
 0x222   : > { %1255 = shalt.err (!%p1252_p5)
}
 0x223   : > { %s1306_s6 = smov 128   ;;  %s1307_s7 = smov 8  }
 0x224   : > { %1089 = dma.vmem_to_hbm [thread:$0]  (%p1625_p2), %s1550_s14, 256, %s1555_s11, %s760_s17, %s1306_s6, %s1306_s6, %s1307_s7  }
 0x225 PF: > { %s788_s28 = sand.u32 1, %s1286_s18   ;;  %p1626_p7 = scmp.ne.s32.totalorder %s1611_s25, 0 }
 0x226   : > { %p1627_p12 = scmp.ge.s32.totalorder %s1298_s21, 2  ;;  %s789_s16 = scalar_lea.sflag [#allocation4], %s788_s28 }
 0x228   : > { %p1103_p13 = pnand %p1627_p12, %p1626_p7 }
 0x22a   : > { %p1104_p0 = pneg %p1103_p13 }
 0x22c   : > { %1281 = dma.done.wait (%p1104_p0), %s789_s16, 256  }
 0x22d   : > { %1283 = vsyncadd (%p1104_p0), %s789_s16, 4294967040  ;;  %p19_p10 = scmp.ge.s32.totalorder %s1416_s15, 4   ;;  %s1628_s18 = smov %s1290_s19 }
 0x22e   : > { %s1629_s19 = smov %s1294_s20  ;;  %s1630_s20 = smov %s1432_s27 }
 0x22f   : > { %s1631_s21 = smov %s1416_s15  ;;  %21 = sbr.rel (!%p19_p10) target bundleno = 6 (0x6), region = 93 }
 0x234   :  { %794 = vsyncpa [#allocation3], 1 }
 0x235   :  { %796 = vsyncpa [#allocation3 + $0x1], 1 }
 0x236   :  { %797 = vsyncpa [#allocation6], 1 }
 0x237   :  { %798 = vsyncpa [#allocation4], 1 }
 0x238   :  { %800 = vsyncpa [#allocation4 + $0x1], 1 }

</bundles_post_ra>
